<compile_context>
chip_gen: v7x
topology: tpu7x:2x2x1
jax: 0.10.0
libtpu: 0.0.40
codegen_flags: <defaults>
</compile_context>

<pallas_src>
import functools

import jax
import jax.numpy as jnp
from jax.experimental import pallas as pl
from jax.experimental.pallas import tpu as pltpu


def _nll_partial_kernel(pred_ref, target_ref, out_ref, *, fuse_log_softmax):
    # pred_ref:   (TB, C)     float (f32 or bf16) log-probs (or logits if fused)
    # target_ref: (TB, 1)     int32 class indices; -1 marks padded/invalid rows
    # out_ref:    (1, 8, 128) f32 lane-dense broadcast of this tile's partial sum
    pred = pred_ref[...].astype(jnp.float32)            # upcast in-VMEM (bf16 path)
    tgt = target_ref[...]                               # (TB, 1) int32
    tb, c = pred.shape

    # One iota + one compare + one select per element.  Padded / out-of-bounds
    # rows carry tgt == -1, which never matches a column, so they add 0.
    col = jax.lax.broadcasted_iota(jnp.int32, (tb, c), 1)
    gathered = jnp.sum(jnp.where(col == tgt, pred, 0.0), axis=-1, keepdims=True)

    if fuse_log_softmax:
        # pred holds raw logits; fold the upstream log_softmax in here.
        # Only the (TB,1) gathered column is shifted by lse — the (TB,C)
        # log-prob tile is never materialized.  exp/log ride the EUP slot.
        m = jnp.max(pred, axis=-1, keepdims=True)
        lse = m + jnp.log(jnp.sum(jnp.exp(pred - m), axis=-1, keepdims=True))
        contrib = jnp.where(tgt >= 0, gathered - lse, 0.0)   # select is NaN-safe
    else:
        contrib = gathered                              # exact F.nll_loss semantics

    partial = jnp.sum(contrib)                          # sum_i logp[i, target[i]]
    out_ref[...] = jnp.broadcast_to(partial, out_ref.shape).astype(out_ref.dtype)


def _vmem_capacity_bytes():
    try:
        return int(pltpu.get_tpu_info().vmem_capacity_bytes)
    except Exception:
        return 64 * 1024 * 1024       # conservative fallback: v7x per-TC VMEM


def get_loss_forward(pred, target, trans_feat=None, *,
                     fuse_log_softmax=False, tile_rows=None):
    """JAX/Pallas equivalent of get_loss.forward(pred, target, trans_feat)."""
    del trans_feat  # unused, exactly like the PyTorch module
    B, C = pred.shape

    # --- generation-aware VMEM budgets -------------------------------------
    vmem_cap = _vmem_capacity_bytes()
    is_small_vmem = vmem_cap <= 64 * 1024 * 1024          # v7x-like (64 MiB/TC)
    vmem_limit = min(vmem_cap // 2, 64 * 1024 * 1024)     # 32 MiB v7x / 64 MiB v5e,v6e
    buf_budget = min(8 * 1024 * 1024, vmem_cap // 8)      # ~8 MiB per input buffer
    min_tiles = 2 if is_small_vmem else 1                 # let both v7x TCs work

    # Bytes of VMEM per batch row: lane-padded pred row + lane-padded (TB,1)
    # int32 target row (128 words).  Budgeting the padded target keeps the
    # double-buffered working set inside `buf_budget` on every generation.
    c_pad = pl.cdiv(C, 128) * 128
    bytes_per_row = c_pad * pred.dtype.itemsize + 128 * 4

    b_pad = pl.cdiv(B, 8) * 8
    if tile_rows is None:
        tb = (buf_budget // bytes_per_row) // 8 * 8
        tb = max(8, tb)
        tb = min(tb, b_pad)
        if min_tiles > 1 and b_pad > 8:
            # Guarantee >= 2 grid tiles so the "parallel" axis can be sharded
            # across the two TensorCores of a v7x chip.
            tb = min(tb, max(8, pl.cdiv(pl.cdiv(b_pad, min_tiles), 8) * 8))
    else:
        assert tile_rows >= 8 and tile_rows % 8 == 0
        tb = min(tile_rows, b_pad)
    g = pl.cdiv(B, tb)

    # --- targets: int32, padded with -1 ------------------------------------
    # Padding to g*tb with -1 means ragged / out-of-bounds rows of the last
    # pred tile can never select a class column (replaces the in-kernel row
    # mask and makes the fused path robust to garbage rows).
    tgt = target.astype(jnp.int32).reshape(B)
    pad = g * tb - B
    if pad:
        tgt = jnp.concatenate([tgt, jnp.full((pad,), -1, dtype=jnp.int32)])
    target_2d = tgt.reshape(g * tb, 1)

    kernel = functools.partial(_nll_partial_kernel,
                               fuse_log_softmax=fuse_log_softmax)

    partials = pl.pallas_call(
        kernel,
        out_shape=jax.ShapeDtypeStruct((g, 8, 128), jnp.float32),
        grid=(g,),
        in_specs=[
            pl.BlockSpec((tb, C), lambda i: (i, 0)),
            pl.BlockSpec((tb, 1), lambda i: (i, 0)),
        ],
        out_specs=pl.BlockSpec((1, 8, 128), lambda i: (i, 0, 0)),
        compiler_params=pltpu.CompilerParams(
            dimension_semantics=("parallel",),            # megacore-shardable (v7x)
            vmem_limit_bytes=vmem_limit,
        ),
        cost_estimate=pl.CostEstimate(
            flops=int(3 * B * C),
            transcendentals=int(B * C if fuse_log_softmax else 0),
            bytes_accessed=int(B * c_pad * pred.dtype.itemsize
                               + g * tb * 128 * 4 + g * 8 * 128 * 4),
        ),
    )(pred, target_2d)

    total = jnp.sum(partials[:, 0, 0])                    # tiny final reduce in XLA
    return -total / B


if __name__ == "__main__":
    key = jax.random.PRNGKey(0)
    k_logits, k_target, k_trans = jax.random.split(key, 3)

    B, C, K = 8, 16, 4  # small shapes: batch=8, num_classes=16, trans_feat KxK

    # pred: log-probabilities, as produced by the classifier's log_softmax head.
    logits = jax.random.normal(k_logits, (B, C), dtype=jnp.float32)
    pred = jax.nn.log_softmax(logits, axis=-1)
    target = jax.random.randint(k_target, (B,), 0, C, dtype=jnp.int32)
    trans_feat = jax.random.normal(k_trans, (B, K, K), dtype=jnp.float32)

    # 1) Exact F.nll_loss semantics (pred = log-probabilities).
    loss = get_loss_forward(pred, target, trans_feat)
    jax.block_until_ready(loss)
    ref = -jnp.mean(pred[jnp.arange(B), target])
    assert jnp.allclose(loss, ref, atol=1e-6, rtol=1e-6), (loss, ref)

    # 2) bf16 pred path: cast happens inside the kernel (half the input DMA bytes).
    pred_bf16 = pred.astype(jnp.bfloat16)
    loss_bf16 = get_loss_forward(pred_bf16, target, trans_feat)
    ref_bf16 = -jnp.mean(pred_bf16.astype(jnp.float32)[jnp.arange(B), target])
    assert jnp.allclose(loss_bf16, ref_bf16, atol=1e-5, rtol=1e-5), (loss_bf16, ref_bf16)

    # 3) Fused log_softmax variant consuming raw logits directly.
    loss_fused = get_loss_forward(logits, target, trans_feat, fuse_log_softmax=True)
    assert jnp.allclose(loss_fused, ref, atol=1e-5, rtol=1e-5), (loss_fused, ref)

    # 4) Multi-tile grid + ragged batch (B not a multiple of the tile).
    B2, C2 = 20, 16
    logits2 = jax.random.normal(jax.random.PRNGKey(1), (B2, C2), dtype=jnp.float32)
    pred2 = jax.nn.log_softmax(logits2, axis=-1)
    target2 = jax.random.randint(jax.random.PRNGKey(2), (B2,), 0, C2, dtype=jnp.int32)
    loss2 = get_loss_forward(pred2, target2, None, tile_rows=8)   # 3 tiles, last ragged
    ref2 = -jnp.mean(pred2[jnp.arange(B2), target2])
    assert jnp.allclose(loss2, ref2, atol=1e-6, rtol=1e-6), (loss2, ref2)

    # 5) Fused path with a ragged last tile (garbage rows masked via tgt == -1).
    loss2_fused = get_loss_forward(logits2, target2, None,
                                   fuse_log_softmax=True, tile_rows=8)
    assert jnp.allclose(loss2_fused, ref2, atol=1e-5, rtol=1e-5), (loss2_fused, ref2)

    jax.block_until_ready((loss, loss_bf16, loss_fused, loss2, loss2_fused))
    print("KERNEL_OK")
</pallas_src>

<mosaic_0001>
module attributes {stable_mosaic.version = 11 : i64} {
  func.func @_nll_partial_kernel(%arg0: i32, %arg1: memref<8x16xf32, #tpu.memory_space<vmem>>, %arg2: memref<8x1xi32, #tpu.memory_space<vmem>>, %arg3: memref<1x8x128xf32, #tpu.memory_space<vmem>>) attributes {dimension_semantics = [#tpu.dimension_semantics<parallel>], iteration_bounds = array<i64: 1>, scalar_prefetch = 0 : i64, scratch_operands = 0 : i64, tpu.core_type = #tpu.core_type<tc>, window_params = [{transform_indices = @transform_0, window_bounds = array<i64: 8, 16>}, {transform_indices = @transform_1, window_bounds = array<i64: 8, 1>}, {transform_indices = @transform_2, window_bounds = array<i64: 1, 8, 128>}]} {
    %c0 = arith.constant 0 : index
    %c0_0 = arith.constant 0 : index
    %0 = vector.load %arg1[%c0, %c0_0] : memref<8x16xf32, #tpu.memory_space<vmem>>, vector<8x16xf32>
    %c0_1 = arith.constant 0 : index
    %c0_2 = arith.constant 0 : index
    %1 = vector.load %arg2[%c0_1, %c0_2] : memref<8x1xi32, #tpu.memory_space<vmem>>, vector<8x1xi32>
    %2 = tpu.iota {dimensions = array<i32: 1>} : vector<8x16xi32>
    %3 = vector.broadcast %1 : vector<8x1xi32> to vector<8x16xi32>
    %4 = arith.cmpi eq, %2, %3 : vector<8x16xi32>
    %cst = arith.constant 0.000000e+00 : f32
    %5 = vector.broadcast %cst : f32 to vector<8x16xf32>
    %6 = arith.select %4, %0, %5 : vector<8x16xi1>, vector<8x16xf32>
    %cst_3 = arith.constant dense<0.000000e+00> : vector<8xf32>
    %7 = vector.multi_reduction <add>, %6, %cst_3 [1] : vector<8x16xf32> to vector<8xf32>
    %8 = vector.shape_cast %7 : vector<8xf32> to vector<8x1xf32>
    %9 = vector.shape_cast %8 : vector<8x1xf32> to vector<1x8x1xf32>
    %cst_4 = arith.constant dense<0.000000e+00> : vector<1xf32>
    %10 = vector.multi_reduction <add>, %9, %cst_4 [1, 2] : vector<1x8x1xf32> to vector<1xf32>
    %11 = vector.shape_cast %10 : vector<1xf32> to vector<1x1x1xf32>
    %12 = vector.extract %11[0, 0, 0] : f32 from vector<1x1x1xf32>
    %13 = vector.broadcast %12 : f32 to vector<1x8x128xf32>
    %c0_5 = arith.constant 0 : index
    %c0_6 = arith.constant 0 : index
    %c0_7 = arith.constant 0 : index
    %14 = vector.load %arg3[%c0_5, %c0_6, %c0_7] : memref<1x8x128xf32, #tpu.memory_space<vmem>>, vector<1x8x128xf32>
    tpu.vector_store %arg3[%c0_5, %c0_6, %c0_7], %13 {strides = array<i32>} : memref<1x8x128xf32, #tpu.memory_space<vmem>>, vector<1x8x128xf32>,
    return
  }
  func.func @transform_0(%arg0: i32) -> (i32, i32) {
    %c0_i32 = arith.constant 0 : i32
    %c0_i32_0 = arith.constant 0 : i32
    return %arg0, %c0_i32 : i32, i32
  }
  func.func @transform_1(%arg0: i32) -> (i32, i32) {
    %c0_i32 = arith.constant 0 : i32
    %c0_i32_0 = arith.constant 0 : i32
    return %arg0, %c0_i32 : i32, i32
  }
  func.func @transform_2(%arg0: i32) -> (i32, i32, i32) {
    %c0_i32 = arith.constant 0 : i32
    %c0_i32_0 = arith.constant 0 : i32
    %c0_i32_1 = arith.constant 0 : i32
    return %arg0, %c0_i32, %c0_i32_0 : i32, i32, i32
  }
}

</mosaic_0001>

<bundles_post_ra>
// kernel: tpu_custom_call.1
= control target key start
LH: loop header
LB: loop body
LE: loop exit
PB: predicated region body
PF: predicated region fallthrough
CT: control target
= control target key end

     0   :  { %s116_s0 = inlined_call_operand.vmem [shape: f32[8,16], index: 0, kind: input, shape index: {}]   ;;  %s117_s1 = inlined_call_operand.vmem [shape: s32[8,1], index: 1, kind: input, shape index: {}]   ;;  %s118_s2 = inlined_call_operand.hbm [shape: f32[1,8,128], index: 2, kind: output, shape index: {}]  }
   0x1   :  { %v13_v0 = vld [vmem:[%s117_s1] sm:$0xff] }
   0x2   :  { %7 = vsyncpa [#allocation3], 0  ;;  %v81_v1 = vmov 0   ;;  %v14_v2 = vlaneseq  ;;  %v12_v4 = vld [vmem:[%s116_s0] sm:$0xff]  ;;  %vm21_vm0 = vcmask 130048   ;;  %vm25_vm2 = vcmask 7168  }
   0x3   :  { %56 = vset.pattern.permute.xlu0 %v81_v1  ;;  %s82_s1 = smov [#allocation2]  }
   0x4   :  { %17 = vperm.xlu0 %56, %v13_v0   ;;  %v15_v3 = vand.u32 127, %v14_v2  ;;  %s44_s0 = sshll.u32 %s82_s1, 4  ;;  %s45_s0 = int_to_ptr.vmem [resolvable:$true] %s44_s0 }
   0x5   :  { %s57_s14 = scalar_lea.vmem %s45_s0, 128  ;;  %p62_p1 = scmp.lt.s32.totalorder %s45_s0, %s45_s0 }
   0x6   :  { %p58_p0 = scmp.ne.s32.totalorder %s45_s0, %s57_s14  ;;  %p63_p2 = scmp.lt.s32.totalorder %s57_s14, %s57_s14 }
   0x8   :  { %p64_p3 = por %p63_p2, %p62_p1 }
   0xa   :  { %p65_p4 = pnand %p64_p3, %p58_p0 }
  0x83   :  { %v18_v5 = vpop.permute.xlu0 %17 }
  0x84   :  { %vm19_vm1 = vcmp.eq.s32.totalorder %v15_v3, %v18_v5 }
  0x85   :  { %v20_v6 = vsel %vm19_vm1, %v12_v4, 0.0 }
  0x86   :  { %v22_v7 = vsel %vm21_vm0, %v20_v6, 0.0 }
  0x87   :  { %23 = vadd.xlane.f32.xlu0 %v22_v7 }
 0x114   :  { %v24_v8 = vpop.xlane.xlu0 %23 }
 0x115   :  { %v26_v9 = vsel %vm25_vm2, %v24_v8, 0.0 }
 0x116   :  { %27 = vadd.xlane.f32.xlu1 %v26_v9 }
 0x1a3   :  { %v28_v10 = vpop.xlane.xlu1 %27 }
 0x1a4   :  { %v29_v11 = vrot.slane %v28_v10, 4 }
 0x1a6   :  { %v30_v12 = vadd.f32 %v29_v11, %v28_v10 }
 0x1a8   :  { %v31_v13 = vrot.slane %v30_v12, 2 }
 0x1aa   :  { %v32_v14 = vadd.f32 %v31_v13, %v30_v12 }
 0x1ac   :  { %v33_v15 = vrot.slane %v32_v14, 1 }
 0x1ae   :  { %v34_v16 = vadd.f32 %v33_v15, %v32_v14 }
 0x1b0   :  { %52 = vpush %v34_v16 }
 0x1e1   :  { %s53_s13 = spop %52 }
 0x1e2   :  { %v36_v17 = vstv %s53_s13 }
 0x1e3   :  { %37 = vst [vmem:[#allocation2] sm:$0xff] %v36_v17 }
 0x1e4   :  { %68 = shalt.err (!%p65_p4)
}
 0x1e5   :  { %s69_s17 = scalar_lea.hbm %s118_s2, 128 }
 0x1e6   :  { %p70_p5 = scmp.ne.s32.totalorder %s118_s2, %s69_s17  ;;  %p73_p6 = scmp.lt.u32.totalorder %s69_s17, %s118_s2 }
 0x1e8   :  { %p75_p7 = pnand %p73_p6, %p70_p5 }
 0x1ea   :  { %78 = shalt.err (!%p75_p7)
}
 0x1eb   :  { %47 = dma.vmem_to_hbm [thread:$0]  %s45_s0, 128, %s118_s2, [#allocation3]  }
 0x1ec   :  { %79 = dma.done.wait [#allocation3], 128  }
 0x1ed   :  { %80 = vsyncadd [#allocation3], 4294967168 }
 0x1ee   :  { %51 = vsyncpa [#allocation3], 1 }

</bundles_post_ra>
